<compile_context>
chip_gen: v7x
topology: tpu7x:2x2x1
jax: 0.10.0
libtpu: 0.0.40
codegen_flags: <defaults>
</compile_context>

<pallas_src>
import functools

import jax
import jax.numpy as jnp
from jax import lax
from jax.experimental import pallas as pl
from jax.experimental.pallas import tpu as pltpu

EPS = 1e-6                      # torch.nn.GaussianNLLLoss default eps
LANES = 128
REDUCE_TILE_ROWS_CAP = 4096     # mean/sum: 3 streams x 2 buffers x 2 MiB = 12 MiB
NONE_TILE_ROWS_CAP = 2048       # none:     4 streams x 2 buffers x 1 MiB =  8 MiB
VMEM_LIMIT_BYTES = 32 * 1024 * 1024   # explicit so the caps above are safe everywhere


def _beta_nll_elem(mean_ref, tgt_ref, var_ref, beta):
    """Per-element beta-NLL, computed in f32.  `beta` is a static Python float."""
    mu = mean_ref[...].astype(jnp.float32)
    t = tgt_ref[...].astype(jnp.float32)
    v = var_ref[...].astype(jnp.float32)

    v_c = jnp.maximum(v, jnp.float32(EPS))
    diff = mu - t
    # Exact divide (NOT approx reciprocal): memory-bound kernel -> free, and it
    # keeps full f32 parity with GaussianNLLLoss.
    nll = jnp.float32(0.5) * (jnp.log(v_c) + diff * diff / v_c)

    # Beta weighting uses the *unclamped* variance; specialize on static beta.
    if beta == 0.0:
        return nll
    if beta == 0.5:
        w = jnp.sqrt(v)
    elif beta == 1.0:
        w = v
    else:
        # v ** beta for v >= 0  (exp(beta * log(0)) == 0 handles v == 0).
        w = jnp.exp(jnp.float32(beta) * jnp.log(v))
    return nll * w


def _tail_mask(shape, row0, total):
    """True where the flat (row-major over (rows,128)) element index < total."""
    row_ids = lax.broadcasted_iota(jnp.int32, shape, 0)
    lane_ids = lax.broadcasted_iota(jnp.int32, shape, 1)
    return (row0 + row_ids) * LANES + lane_ids < total


def _partial_kernel(mean_ref, tgt_ref, var_ref, part_ref, *, beta, total, tile_rows):
    """Multi-tile mean/sum: per-tile partial sums folded to one (8,128) block."""
    loss = _beta_nll_elem(mean_ref, tgt_ref, var_ref, beta)   # (tile_rows, 128) f32
    i = pl.program_id(0)
    last = pl.num_programs(0) - 1

    def _fold(x):
        return x.reshape(tile_rows // 8, 8, LANES).sum(axis=0)

    @pl.when(i != last)
    def _():
        part_ref[...] = _fold(loss)

    @pl.when(i == last)
    def _():
        # Last tile may over-cover the array (ragged rows and/or lane tail).
        # Select-masking drops any garbage/NaN from the over-hang region.
        mask = _tail_mask(loss.shape, i * tile_rows, total)
        part_ref[...] = _fold(jnp.where(mask, loss, jnp.float32(0.0)))


def _scalar_kernel(mean_ref, tgt_ref, var_ref, sum_ref, *, beta, total):
    """Single-tile mean/sum: full in-kernel reduction to an SMEM scalar."""
    loss = _beta_nll_elem(mean_ref, tgt_ref, var_ref, beta)
    mask = _tail_mask(loss.shape, 0, total)
    sum_ref[0, 0] = jnp.sum(jnp.where(mask, loss, jnp.float32(0.0)))


def _none_kernel(mean_ref, tgt_ref, var_ref, out_ref, *, beta):
    out_ref[...] = _beta_nll_elem(mean_ref, tgt_ref, var_ref, beta).astype(out_ref.dtype)


def beta_nll(mean, targets, variance, beta=0.5, reduction="mean", *, tile_rows_cap=None):
    """BetaNLL forward.  `tile_rows_cap` is a test hook (must be a multiple of 8)."""
    beta = float(beta)
    if beta < 0.0 or beta > 1.0:
        raise ValueError(f"The beta parameter should be in range [0, 1], but got {beta}.")
    if reduction not in ("none", "mean", "sum"):
        raise ValueError(f"{reduction} is not a valid value for reduction.")

    orig_shape = mean.shape
    out_dtype = jnp.result_type(mean.dtype, targets.dtype, variance.dtype)
    total = int(mean.size)
    in_itemsize = jnp.dtype(mean.dtype).itemsize

    rows = -(-total // LANES)            # cdiv(total, 128)
    lane_pad = rows * LANES - total      # < 128; non-zero only for ragged totals

    def _as_2d(x):
        x = x.reshape(-1)
        if lane_pad:
            # Tiny pad just to complete the last 128-lane row.  Values are
            # irrelevant: kernels mask on the true `total`, and the 'none'
            # path trims the tail.  When total % 128 == 0 this is a free view.
            x = jnp.pad(x, (0, lane_pad))
        return x.reshape(rows, LANES)

    m2, t2, v2 = _as_2d(mean), _as_2d(targets), _as_2d(variance)

    if reduction in ("mean", "sum"):
        cap = REDUCE_TILE_ROWS_CAP if tile_rows_cap is None else int(tile_rows_cap)
        cost = pl.CostEstimate(flops=8 * total, transcendentals=2 * total,
                               bytes_accessed=3 * total * in_itemsize + 4096)
        if rows <= cap:
            # Single tile: no grid, reduce fully in-kernel -> one dispatch.
            s2 = pl.pallas_call(
                functools.partial(_scalar_kernel, beta=beta, total=total),
                out_shape=jax.ShapeDtypeStruct((1, 1), jnp.float32),
                in_specs=[pl.BlockSpec(memory_space=pltpu.MemorySpace.VMEM)] * 3,
                out_specs=pl.BlockSpec(memory_space=pltpu.MemorySpace.SMEM),
                compiler_params=pltpu.CompilerParams(
                    vmem_limit_bytes=VMEM_LIMIT_BYTES),
                cost_estimate=cost,
            )(m2, t2, v2)
            s = s2[0, 0]
        else:
            tile_rows = cap              # multiple of 8 (and 16/32 for packed dtypes)
            n_tiles = -(-rows // tile_rows)   # last block over-covers; masked in-kernel
            tile_spec = pl.BlockSpec((tile_rows, LANES), lambda i: (i, 0))
            partials = pl.pallas_call(
                functools.partial(_partial_kernel, beta=beta, total=total,
                                  tile_rows=tile_rows),
                out_shape=jax.ShapeDtypeStruct((n_tiles * 8, LANES), jnp.float32),
                grid=(n_tiles,),
                in_specs=[tile_spec, tile_spec, tile_spec],
                out_specs=pl.BlockSpec((8, LANES), lambda i: (i, 0)),
                compiler_params=pltpu.CompilerParams(
                    dimension_semantics=("parallel",),      # both TCs on v7x
                    vmem_limit_bytes=VMEM_LIMIT_BYTES),
                cost_estimate=cost,
            )(m2, t2, v2)
            s = jnp.sum(partials)
        if reduction == "mean":
            s = s / jnp.float32(total)
        return s.astype(out_dtype)

    # reduction == 'none': per-element loss, same shape & dtype as inputs.
    cap = NONE_TILE_ROWS_CAP if tile_rows_cap is None else int(tile_rows_cap)
    if rows <= cap:
        tile_rows, n_tiles = rows, 1                 # block == full array dims
    else:
        tile_rows, n_tiles = cap, -(-rows // cap)    # last block over-covers;
                                                     # OOB output writes are dropped
    tile_spec = pl.BlockSpec((tile_rows, LANES), lambda i: (i, 0))
    out_itemsize = jnp.dtype(out_dtype).itemsize
    cost = pl.CostEstimate(flops=8 * total, transcendentals=2 * total,
                           bytes_accessed=(3 * in_itemsize + out_itemsize) * total)
    out = pl.pallas_call(
        functools.partial(_none_kernel, beta=beta),
        out_shape=jax.ShapeDtypeStruct((rows, LANES), out_dtype),
        grid=(n_tiles,),
        in_specs=[tile_spec, tile_spec, tile_spec],
        out_specs=tile_spec,
        compiler_params=pltpu.CompilerParams(
            dimension_semantics=("parallel",),
            vmem_limit_bytes=VMEM_LIMIT_BYTES),
        cost_estimate=cost,
    )(m2, t2, v2)
    out = out.reshape(-1)
    if lane_pad:
        out = out[:total]
    return out.reshape(orig_shape)


def beta_nll_ref(mean, targets, variance, beta=0.5, reduction="mean"):
    v_c = jnp.maximum(variance, EPS)
    nll = 0.5 * (jnp.log(v_c) + (mean - targets) ** 2 / v_c)
    loss = nll * jnp.power(variance, beta)
    if reduction == "mean":
        return loss.mean()
    if reduction == "sum":
        return loss.sum()
    return loss


if __name__ == "__main__":
    key = jax.random.PRNGKey(0)
    k_mean, k_tgt, k_var = jax.random.split(key, 3)

    def make_inputs(shape):
        m = jax.random.normal(k_mean, shape, dtype=jnp.float32)
        t = jax.random.normal(k_tgt, shape, dtype=jnp.float32)
        v = jnp.exp(0.5 * jax.random.normal(k_var, shape, dtype=jnp.float32))  # > 0
        return m, t, v

    def check(got, want):
        return bool(jnp.allclose(got, want, rtol=1e-5, atol=1e-5))

    ok = True

    # 1) Default tiling (single-tile fast paths), all reductions.
    mean, targets, variance = make_inputs((2, 4, 16, 16))
    for reduction in ("mean", "sum", "none"):
        got = jax.block_until_ready(beta_nll(mean, targets, variance, 0.5, reduction))
        ok &= check(got, beta_nll_ref(mean, targets, variance, 0.5, reduction))

    # 2) Specialized / generic beta paths.
    for b in (0.0, 1.0, 0.25):
        got = jax.block_until_ready(beta_nll(mean, targets, variance, b, "mean"))
        ok &= check(got, beta_nll_ref(mean, targets, variance, b, "mean"))

    # 3) Force the multi-tile grid paths with a tiny tile cap, including a
    #    ragged last tile (rows = 20, tile_rows = 8 -> 3 tiles, last over-covers).
    mean2, targets2, variance2 = make_inputs((2, 5, 16, 16))
    for reduction in ("mean", "sum", "none"):
        got = jax.block_until_ready(
            beta_nll(mean2, targets2, variance2, 0.5, reduction, tile_rows_cap=8))
        ok &= check(got, beta_nll_ref(mean2, targets2, variance2, 0.5, reduction))

    # 4) Element count not a multiple of 128 (in-kernel lane-tail masking).
    mean3, targets3, variance3 = make_inputs((3, 7, 11))
    for reduction in ("mean", "sum", "none"):
        got = jax.block_until_ready(beta_nll(mean3, targets3, variance3, 0.5, reduction))
        ok &= check(got, beta_nll_ref(mean3, targets3, variance3, 0.5, reduction))

    print("KERNEL_OK" if ok else "KERNEL_MISMATCH")
</pallas_src>

<mosaic_0001>
module attributes {stable_mosaic.version = 11 : i64} {
  func.func @_scalar_kernel(%arg0: memref<16x128xf32, #tpu.memory_space<vmem>>, %arg1: memref<16x128xf32, #tpu.memory_space<vmem>>, %arg2: memref<16x128xf32, #tpu.memory_space<vmem>>, %arg3: memref<1x1xf32, #tpu.memory_space<smem>>) attributes {dimension_semantics = [], scalar_prefetch = 0 : i64, scratch_operands = 0 : i64, tpu.core_type = #tpu.core_type<tc>} {
    %c0 = arith.constant 0 : index
    %c0_0 = arith.constant 0 : index
    %0 = vector.load %arg0[%c0, %c0_0] : memref<16x128xf32, #tpu.memory_space<vmem>>, vector<16x128xf32>
    %c0_1 = arith.constant 0 : index
    %c0_2 = arith.constant 0 : index
    %1 = vector.load %arg1[%c0_1, %c0_2] : memref<16x128xf32, #tpu.memory_space<vmem>>, vector<16x128xf32>
    %c0_3 = arith.constant 0 : index
    %c0_4 = arith.constant 0 : index
    %2 = vector.load %arg2[%c0_3, %c0_4] : memref<16x128xf32, #tpu.memory_space<vmem>>, vector<16x128xf32>
    %cst = arith.constant 9.99999997E-7 : f32
    %3 = vector.broadcast %cst : f32 to vector<16x128xf32>
    %4 = arith.maximumf %2, %3 : vector<16x128xf32>
    %5 = arith.subf %0, %1 : vector<16x128xf32>
    %6 = math.log %4 : vector<16x128xf32>
    %7 = arith.mulf %5, %5 : vector<16x128xf32>
    %8 = arith.divf %7, %4 : vector<16x128xf32>
    %9 = arith.addf %6, %8 : vector<16x128xf32>
    %cst_5 = arith.constant 5.000000e-01 : f32
    %10 = vector.broadcast %cst_5 : f32 to vector<16x128xf32>
    %11 = arith.mulf %10, %9 : vector<16x128xf32>
    %12 = math.sqrt %2 : vector<16x128xf32>
    %13 = arith.mulf %11, %12 : vector<16x128xf32>
    %14 = tpu.iota {dimensions = array<i32: 0>} : vector<16x128xi32>
    %15 = tpu.iota {dimensions = array<i32: 1>} : vector<16x128xi32>
    %c0_i32 = arith.constant 0 : i32
    %16 = vector.broadcast %c0_i32 : i32 to vector<16x128xi32>
    %17 = arith.addi %16, %14 : vector<16x128xi32>
    %c128_i32 = arith.constant 128 : i32
    %18 = vector.broadcast %c128_i32 : i32 to vector<16x128xi32>
    %19 = arith.muli %17, %18 : vector<16x128xi32>
    %20 = arith.addi %19, %15 : vector<16x128xi32>
    %c2048_i32 = arith.constant 2048 : i32
    %21 = vector.broadcast %c2048_i32 : i32 to vector<16x128xi32>
    %22 = arith.cmpi slt, %20, %21 : vector<16x128xi32>
    %cst_6 = arith.constant 0.000000e+00 : f32
    %23 = vector.broadcast %cst_6 : f32 to vector<16x128xf32>
    %24 = arith.select %22, %13, %23 : vector<16x128xi1>, vector<16x128xf32>
    %25 = vector.shape_cast %24 : vector<16x128xf32> to vector<1x16x128xf32>
    %cst_7 = arith.constant dense<0.000000e+00> : vector<1xf32>
    %26 = vector.multi_reduction <add>, %25, %cst_7 [1, 2] : vector<1x16x128xf32> to vector<1xf32>
    %27 = vector.shape_cast %26 : vector<1xf32> to vector<1x1x1xf32>
    %28 = vector.extract %27[0, 0, 0] : f32 from vector<1x1x1xf32>
    %c0_8 = arith.constant 0 : index
    %c0_9 = arith.constant 0 : index
    %29 = memref.load %arg3[%c0_8, %c0_9] : memref<1x1xf32, #tpu.memory_space<smem>>
    memref.store %28, %arg3[%c0_8, %c0_9] : memref<1x1xf32, #tpu.memory_space<smem>>
    return
  }
}

</mosaic_0001>

<bundles_post_ra>
// kernel: tpu_custom_call.1
= control target key start
LH: loop header
LB: loop body
LE: loop exit
PB: predicated region body
PF: predicated region fallthrough
CT: control target
= control target key end

     0   :  { %8 = vsyncpa [#allocation3], 0  ;;  %s328_s0 = inlined_call_operand.hbm [shape: f32[16,128], index: 0, kind: input, shape index: {}]   ;;  %s329_s1 = inlined_call_operand.hbm [shape: f32[16,128], index: 1, kind: input, shape index: {}]   ;;  %s330_s2 = inlined_call_operand.hbm [shape: f32[16,128], index: 2, kind: input, shape index: {}]   ;;  %s331_s3 = inlined_call_operand.hbm [shape: f32[1,1], index: 3, kind: output, shape index: {}]  }
   0x1   :  { %9 = vsyncpa [#allocation6], 0 }
   0x2   :  { %10 = vsyncpa [#allocation4], 0  ;;  %s238_s12 = smov [#allocation5]   ;;  %s239_s14 = smov [#allocation2]  }
   0x3   :  { %s28_s13 = sshll.u32 %s238_s12, 4  ;;  %s16_s15 = sshll.u32 %s239_s14, 4  ;;  %s29_s13 = int_to_ptr.vmem [resolvable:$true] %s28_s13  ;;  %s264_s15 = int_to_ptr.vmem [resolvable:$true] %s16_s15 }
   0x4   :  { %s156_s18 = scalar_lea.hbm %s329_s1, 256 }
   0x5   :  { %p157_p0 = scmp.ne.s32.totalorder %s329_s1, %s156_s18  ;;  %p160_p1 = scmp.lt.u32.totalorder %s156_s18, %s329_s1 }
   0x7   :  { %p162_p2 = pnand %p160_p1, %p157_p0 }
   0x9   :  { %165 = shalt.err (!%p162_p2)
}
   0xa   :  { %s166_s23 = scalar_lea.vmem %s29_s13, 256  ;;  %p171_p4 = scmp.lt.s32.totalorder %s29_s13, %s29_s13 }
   0xb   :  { %p167_p3 = scmp.ne.s32.totalorder %s29_s13, %s166_s23  ;;  %p172_p5 = scmp.lt.s32.totalorder %s166_s23, %s166_s23 }
   0xd   :  { %p173_p6 = por %p172_p5, %p171_p4 }
   0xf   :  { %p174_p7 = pnand %p173_p6, %p167_p3 }
  0x11   :  { %177 = shalt.err (!%p174_p7)
}
  0x12   :  { %s240_s24 = smov 128   ;;  %s241_s25 = smov 8  }
  0x13   :  { %34 = dma.hbm_to_vmem [thread:$0]  %s329_s1, 256, %s29_s13, [#allocation6], %s240_s24, %s240_s24, %s241_s25  }
  0x14   :  { %s178_s30 = scalar_lea.hbm %s328_s0, 256 }
  0x15   :  { %p179_p8 = scmp.ne.s32.totalorder %s328_s0, %s178_s30  ;;  %p182_p9 = scmp.lt.u32.totalorder %s178_s30, %s328_s0 }
  0x17   :  { %p184_p10 = pnand %p182_p9, %p179_p8 }
  0x19   :  { %187 = shalt.err (!%p184_p10)
}
  0x1a   :  { %s188_s8 = scalar_lea.vmem %s264_s15, 256  ;;  %p193_p12 = scmp.lt.s32.totalorder %s264_s15, %s264_s15 }
  0x1b   :  { %p189_p11 = scmp.ne.s32.totalorder %s264_s15, %s188_s8  ;;  %p194_p13 = scmp.lt.s32.totalorder %s188_s8, %s188_s8 }
  0x1d   :  { %p195_p0 = por %p194_p13, %p193_p12 }
  0x1f   :  { %p196_p1 = pnand %p195_p0, %p189_p11 }
  0x21   :  { %199 = shalt.err (!%p196_p1)
}
  0x22   :  { %22 = dma.hbm_to_vmem [thread:$0]  %s328_s0, 256, %s264_s15, [#allocation3], %s240_s24, %s240_s24, %s241_s25  }
  0x23   :  { %s242_s10 = smov [#allocation7]   ;;  %s200_s14 = scalar_lea.hbm %s330_s2, 256 }
  0x24   :  { %s40_s11 = sshll.u32 %s242_s10, 4  ;;  %p201_p2 = scmp.ne.s32.totalorder %s330_s2, %s200_s14  ;;  %s41_s11 = int_to_ptr.vmem [resolvable:$true] %s40_s11 }
  0x25   :  { %p204_p3 = scmp.lt.u32.totalorder %s200_s14, %s330_s2 }
  0x27   :  { %p206_p4 = pnand %p204_p3, %p201_p2 }
  0x29   :  { %209 = shalt.err (!%p206_p4)
}
  0x2a   :  { %s210_s20 = scalar_lea.vmem %s41_s11, 256  ;;  %p215_p6 = scmp.lt.s32.totalorder %s41_s11, %s41_s11 }
  0x2b   :  { %p211_p5 = scmp.ne.s32.totalorder %s41_s11, %s210_s20  ;;  %p216_p7 = scmp.lt.s32.totalorder %s210_s20, %s210_s20 }
  0x2d   :  { %p217_p8 = por %p216_p7, %p215_p6 }
  0x2f   :  { %p218_p9 = pnand %p217_p8, %p211_p5 }
  0x31   :  { %221 = shalt.err (!%p218_p9)
}
  0x32   :  { %46 = dma.hbm_to_vmem [thread:$0]  %s330_s2, 256, %s41_s11, [#allocation6], %s240_s24, %s240_s24, %s241_s25  }
  0x33   :  { %232 = dma.done.wait [#allocation3], 256  }
  0x34   :  { %233 = vsyncadd [#allocation3], 4294967040 }
  0x35   :  { %234 = dma.done.wait [#allocation6], 512  }
  0x36   :  { %235 = vsyncadd [#allocation6], 4294966784  ;;  %v60_v0 = vld [vmem:[#allocation7] sm:$0xff]  ;;  %v61_v1 = vld [vmem:[#allocation7 + $0x8] sm:$0xff]  ;;  %v96_v4 = vlaneseq  ;;  %s222_s23 = scalar_lea.hbm %s331_s3, 16 }
  0x37   :  { %v62_v2 = vmax.f32 %v60_v0, 1e-06  ;;  %v63_v3 = vmax.f32 %v61_v1, 1e-06  ;;  %144 = vrsqrt.f32 %v60_v0  ;;  %v56_v5 = vld [vmem:[#allocation2] sm:$0xff]  ;;  %v58_v6 = vld [vmem:[#allocation5] sm:$0xff]  ;;  %p223_p10 = scmp.ne.s32.totalorder %s331_s3, %s222_s23  ;;  %p226_p11 = scmp.lt.u32.totalorder %s222_s23, %s331_s3 }
  0x38   :  { %v57_v7 = vld [vmem:[#allocation2 + $0x8] sm:$0xff]  ;;  %v59_v8 = vld [vmem:[#allocation5 + $0x8] sm:$0xff]  ;;  %v97_v9 = vshrl.u32 %v96_v4, 7  ;;  %v64_v10 = vsub.f32 %v56_v5, %v58_v6  ;;  %vm82_vm0 = vcmp.eq.f32.partialorder %v60_v0, inf  ;;  %v100_v18 = vand.u32 127, %v96_v4 }
  0x39   :  { %146 = vlog2.f32 %v62_v2  ;;  %v65_v11 = vsub.f32 %v57_v7, %v59_v8  ;;  %v85_v25 = vand.u32 2147483648, %v60_v0  ;;  %vm84_vm1 = vcmp.eq.f32.partialorder %v60_v0, 0.0  ;;  %p228_p12 = pnand %p226_p11, %p223_p10 }
  0x3a   :  { %148 = vlog2.f32 %v63_v3  ;;  %v98_v12 = vadd.s32 8, %v97_v9  ;;  %v70_v14 = vmul.f32 %v64_v10, %v64_v10  ;;  %v101_v19 = vmul.u32 128, %v97_v9 }
  0x3b   :  { %150 = vrcp.f32 %v62_v2  ;;  %v71_v17 = vmul.f32 %v65_v11, %v65_v11  ;;  %vm89_vm2 = vcmp.eq.f32.partialorder %v61_v1, inf  ;;  %v92_v31 = vand.u32 2147483648, %v61_v1 }
  0x3c   :  { %152 = vrcp.f32 %v63_v3  ;;  %v102_v22 = vmul.u32 128, %v98_v12  ;;  %v103_v32 = vadd.s32 %v101_v19, %v100_v18  ;;  %vm91_vm3 = vcmp.eq.f32.partialorder %v61_v1, 0.0 }
  0x3d   :  { %154 = vrsqrt.f32 %v61_v1 }
  0x3e   :  { %v104_v35 = vadd.s32 %v102_v22, %v100_v18  ;;  %vm105_vm4 = vcmp.lt.s32.totalorder %v103_v32, 2048 }
  0x40   :  { %vm106_vm5 = vcmp.lt.s32.totalorder %v104_v35, 2048 }
  0x41   :  { %v145_v13 = vpop.eup %144 }
  0x42   :  { %v81_v15 = vmul.f32 %v145_v13, %v60_v0 }
  0x43   :  { %v147_v16 = vpop.eup %146 }
  0x44   :  { %v149_v20 = vpop.eup %148  ;;  %v67_v21 = vmul.f32 0.6931472, %v147_v16  ;;  %v83_v28 = vsel %vm82_vm0, %v60_v0, %v81_v15 }
  0x45   :  { %v151_v23 = vpop.eup %150  ;;  %v69_v24 = vmul.f32 0.6931472, %v149_v20  ;;  %v86_v37 = vsel %vm84_vm1, %v85_v25, %v83_v28 }
  0x46   :  { %v153_v26 = vpop.eup %152  ;;  %v73_v27 = vmul.f32 %v151_v23, %v70_v14 }
  0x47   :  { %v155_v29 = vpop.eup %154  ;;  %v75_v30 = vmul.f32 %v153_v26, %v71_v17 }
  0x48   :  { %v76_v33 = vadd.f32 %v73_v27, %v67_v21  ;;  %v88_v34 = vmul.f32 %v155_v29, %v61_v1 }
  0x49   :  { %v77_v36 = vadd.f32 %v75_v30, %v69_v24 }
  0x4a   :  { %v78_v38 = vmul.f32 0.5, %v76_v33  ;;  %v90_v39 = vsel %vm89_vm2, %v61_v1, %v88_v34 }
  0x4b   :  { %v79_v40 = vmul.f32 0.5, %v77_v36  ;;  %v93_v41 = vsel %vm91_vm3, %v92_v31, %v90_v39 }
  0x4c   :  { %v94_v42 = vmul.f32 %v86_v37, %v78_v38 }
  0x4d   :  { %v95_v43 = vmul.f32 %v93_v41, %v79_v40 }
  0x4e   :  { %v107_v44 = vsel %vm105_vm4, %v94_v42, 0.0 }
  0x4f   :  { %v108_v45 = vsel %vm106_vm5, %v95_v43, 0.0 }
  0x50   :  { %v109_v46 = vadd.f32 %v108_v45, %v107_v44 }
  0x52   :  { %110 = vadd.xlane.f32.xlu0 %v109_v46 }
  0xdf   :  { %v111_v47 = vpop.xlane.xlu0 %110 }
  0xe0   :  { %v112_v48 = vrot.slane %v111_v47, 4 }
  0xe2   :  { %v113_v49 = vadd.f32 %v112_v48, %v111_v47 }
  0xe4   :  { %v114_v50 = vrot.slane %v113_v49, 2 }
  0xe6   :  { %v115_v51 = vadd.f32 %v114_v50, %v113_v49 }
  0xe8   :  { %v116_v52 = vrot.slane %v115_v51, 1 }
  0xea   :  { %v117_v53 = vadd.f32 %v116_v52, %v115_v51 }
  0xec   :  { %136 = vpush %v117_v53 }
 0x11d   :  { %s137_s2 = spop %136 }
 0x11e   :  { %120 = sst [smem:[#allocation8]] %s137_s2 }
 0x11f   :  { %231 = shalt.err (!%p228_p12)
}
 0x120   :  { %s243_s28 = smov [#allocation8]  }
 0x121   :  { %128 = dma.smem_to_hbm %s243_s28, 16, %s331_s3, [#allocation4]  }
 0x122   :  { %236 = dma.done.wait [#allocation4], 16  }
 0x123   :  { %237 = vsyncadd [#allocation4], 4294967280 }
 0x124   :  { %132 = sfence }
 0x125   :  { %133 = vsyncpa [#allocation3], 1 }
 0x126   :  { %134 = vsyncpa [#allocation6], 1 }
 0x127   :  { %135 = vsyncpa [#allocation4], 1 }

</bundles_post_ra>
